<compile_context>
chip_gen: v6e
topology: v6e:2x2x1
jax: 0.10.0
libtpu: 0.0.40
codegen_flags: <defaults>
</compile_context>

<pallas_src>
import jax
import jax.numpy as jnp
from jax.experimental import pallas as pl
from jax.experimental.pallas import tpu as pltpu

_VMEM_X_BUDGET = 20 << 20     # bytes for streaming x tiles (x2 buffers) + f32 h scratch
_VMEM_LIMIT_CAP = 48 << 20    # keep scoped-VMEM request inside v7x's 64 MiB physical
_MIN_SPLIT_ROWS = 4096        # only force >=2 grid steps (v7x 2-TC sharding) above this


def _round_up(x, m):
    return (x + m - 1) // m * m


def _critic_kernel(x_ref, w1_ref, b1_ref, w2_ref, b2_ref, o_ref):
    # x_ref: (TB, D); w1_ref: (D, H); b1_ref/w2_ref: (1, H); b2_ref: (1, 1) SMEM;
    # o_ref: (1, TB) lane-dense output row (batch on the lane axis).
    # Cast x after the DMA (no wrapper-side cast pass); no-op for the f32 path.
    x = x_ref[...].astype(w1_ref.dtype)
    # First Linear on the MXU, f32 accumulation regardless of input dtype.
    h = jnp.dot(x, w1_ref[...], preferred_element_type=jnp.float32)      # (TB, H)
    # Bias + ReLU on the VPU, in f32.
    h = jnp.maximum(h + b1_ref[...], 0.0)
    # Second Linear (H -> 1): VPU multiply + lane reduce (XLU slot), not a second
    # MXU matmul (single MXU pipeline drain per tile).
    col = jnp.sum(h * w2_ref[...], axis=-1) + b2_ref[0, 0]               # (TB,)
    # Lane-dense store: batch sits on the lane axis of the (1, TB) block.
    o_ref[...] = col[None, :].astype(o_ref.dtype)


def _choose_batch_tile(B, D, H, x_itemsize):
    """Rows per grid step, sized from a VMEM budget (128-lane padding included)."""
    d_lanes = _round_up(max(D, 1), 128)      # x tile is lane-padded to 128
    h_lanes = _round_up(max(H, 1), 128)      # f32 h intermediate, lane-padded
    per_row = 2 * d_lanes * x_itemsize + h_lanes * 4
    tb_max = max((_VMEM_X_BUDGET // per_row) // 128 * 128, 128)
    if B > tb_max:
        return tb_max
    if B >= _MIN_SPLIT_ROWS:
        # Keep >= 2 grid steps so dimension_semantics=("parallel",) can shard the
        # batch axis across v7x's two TensorCores.
        return _round_up(pl.cdiv(B, 2), 128)
    return B                                  # single whole block for small B


def _vmem_bytes_estimate(tb, D, H, x_itemsize, w_itemsize):
    d_lanes = _round_up(max(D, 1), 128)
    h_lanes = _round_up(max(H, 1), 128)
    tb_sub = _round_up(tb, 8)
    x_bufs = 2 * tb_sub * d_lanes * x_itemsize             # double-buffered x tile
    w1_bufs = 2 * _round_up(D, 8) * h_lanes * w_itemsize   # resident weight (2 bufs)
    small = 4 * 8 * h_lanes * 4                             # b1 + w2 rows, 2 bufs each
    h_tmp = tb_sub * h_lanes * 4                            # f32 intermediate
    out_bufs = 2 * 8 * _round_up(tb, 128) * 4               # (1, TB) output, 2 bufs
    return x_bufs + w1_bufs + small + h_tmp + out_bufs


def prepare_critic_params(w1, b1, w2, b2, matmul_dtype=jnp.float32):
    """One-time parameter prep (PyTorch layouts in -> kernel layouts out).

    w1: (H, D) Linear(D, H).weight  -> (D, H) matmul_dtype
    b1: (H,)   Linear(D, H).bias    -> (1, H) f32
    w2: (1, H) Linear(H, 1).weight  -> (1, H) f32 (row form for the VPU reduce)
    b2: (1,)   Linear(H, 1).bias    -> (1, 1) f32 (SMEM scalar)
    """
    H, D = w1.shape
    w1_t = jnp.asarray(w1).astype(matmul_dtype).T
    b1_r = jnp.asarray(b1, jnp.float32).reshape(1, H)
    w2_r = jnp.asarray(w2, jnp.float32).reshape(1, H)
    b2_s = jnp.asarray(b2, jnp.float32).reshape(1, 1)
    return w1_t, b1_r, w2_r, b2_s


@jax.jit
def critic_layer_forward(x, w1_t, b1_r, w2_r, b2_s):
    """x: (B, D); params from prepare_critic_params(). Returns (B, 1) f32."""
    B, D = x.shape
    H = w1_t.shape[1]

    tb = _choose_batch_tile(B, D, H, x.dtype.itemsize)
    num_tiles = pl.cdiv(B, tb)

    est = _vmem_bytes_estimate(tb, D, H, x.dtype.itemsize, w1_t.dtype.itemsize)
    vmem_limit = int(min(_VMEM_LIMIT_CAP, max(est + (2 << 20), 16 << 20)))

    x_bytes = B * D * x.dtype.itemsize
    w_bytes = (w1_t.size * w1_t.dtype.itemsize + b1_r.size * 4 + w2_r.size * 4 + 4)
    cost = pl.CostEstimate(
        flops=2 * B * H * (D + 1),
        transcendentals=0,
        bytes_accessed=int(x_bytes + w_bytes + B * 4),
    )

    out = pl.pallas_call(
        _critic_kernel,
        out_shape=jax.ShapeDtypeStruct((1, B), jnp.float32),
        grid=(num_tiles,),
        in_specs=[
            pl.BlockSpec((tb, D), lambda i: (i, 0)),            # x streamed over batch
            # w1/b1/w2 are resident (constant index maps).  On v7x with
            # production-sized weights (e.g. D=H=2048 f32 -> 16 MiB w1) add
            # pipeline_mode=pl.Buffered(1) here to drop their second VMEM buffer.
            pl.BlockSpec((D, H), lambda i: (0, 0)),
            pl.BlockSpec((1, H), lambda i: (0, 0)),
            pl.BlockSpec((1, H), lambda i: (0, 0)),
            pl.BlockSpec(memory_space=pltpu.MemorySpace.SMEM),   # b2 scalar
        ],
        out_specs=pl.BlockSpec((1, tb), lambda i: (0, i)),       # lane-dense row
        compiler_params=pltpu.CompilerParams(
            dimension_semantics=("parallel",),
            vmem_limit_bytes=vmem_limit,
        ),
        cost_estimate=cost,
    )(x, w1_t, b1_r, w2_r, b2_s)

    # (1, B) -> (B, 1): tiny output, free layout plumbing in the wrapper.
    return out.reshape(B, 1)


def _reference_forward(x, w1, b1, w2, b2):
    h = jnp.maximum(x @ w1.T + b1, 0.0)
    return h @ w2.T + b2


if __name__ == "__main__":
    # Small shapes consistent with the module: dim_input=32, hidden=32, batch=8.
    B, D, H = 8, 32, 32

    key = jax.random.PRNGKey(0)
    k_x, k_w1, k_b1, k_w2, k_b2 = jax.random.split(key, 5)

    # Deterministic parameter init (PyTorch-style uniform bounds; synthetic).
    lim1 = float(1.0 / (D ** 0.5))
    lim2 = float(1.0 / (H ** 0.5))
    w1 = jax.random.uniform(k_w1, (H, D), jnp.float32, -lim1, lim1)   # Linear(D, H).weight
    b1 = jax.random.uniform(k_b1, (H,), jnp.float32, -lim1, lim1)     # Linear(D, H).bias
    w2 = jax.random.uniform(k_w2, (1, H), jnp.float32, -lim2, lim2)   # Linear(H, 1).weight
    b2 = jax.random.uniform(k_b2, (1,), jnp.float32, -lim2, lim2)     # Linear(H, 1).bias

    x = jax.random.normal(k_x, (B, D), jnp.float32)

    # One-time parameter prep (outside the hot path), then the jitted kernel call.
    params = prepare_critic_params(w1, b1, w2, b2)
    out = jax.block_until_ready(critic_layer_forward(x, *params))

    ref = _reference_forward(x, w1, b1, w2, b2)
    assert out.shape == (B, 1)
    assert jnp.allclose(out, ref, atol=1e-5, rtol=1e-5)

    print("KERNEL_OK")
</pallas_src>

<mosaic_0001>
module attributes {stable_mosaic.version = 11 : i64} {
  func.func @_critic_kernel(%arg0: i32, %arg1: memref<8x32xf32, #tpu.memory_space<vmem>>, %arg2: memref<32x32xf32, #tpu.memory_space<vmem>>, %arg3: memref<1x32xf32, #tpu.memory_space<vmem>>, %arg4: memref<1x32xf32, #tpu.memory_space<vmem>>, %arg5: memref<1x1xf32, #tpu.memory_space<smem>>, %arg6: memref<1x8xf32, #tpu.memory_space<vmem>>) attributes {dimension_semantics = [#tpu.dimension_semantics<parallel>], iteration_bounds = array<i64: 1>, scalar_prefetch = 0 : i64, scratch_operands = 0 : i64, tpu.core_type = #tpu.core_type<tc>, window_params = [{transform_indices = @transform_0, window_bounds = array<i64: 8, 32>}, {pipeline_mode = #tpu.pipeline_mode<synchronous>, transform_indices = @transform_1, window_bounds = array<i64: 32, 32>}, {pipeline_mode = #tpu.pipeline_mode<synchronous>, transform_indices = @transform_2, window_bounds = array<i64: 1, 32>}, {pipeline_mode = #tpu.pipeline_mode<synchronous>, transform_indices = @transform_3, window_bounds = array<i64: 1, 32>}, {transform_indices = @transform_4, window_bounds = array<i64: 1, 1>}, {transform_indices = @transform_5, window_bounds = array<i64: 1, 8>}]} {
    %c0 = arith.constant 0 : index
    %c0_0 = arith.constant 0 : index
    %0 = vector.load %arg1[%c0, %c0_0] : memref<8x32xf32, #tpu.memory_space<vmem>>, vector<8x32xf32>
    %c0_1 = arith.constant 0 : index
    %c0_2 = arith.constant 0 : index
    %1 = vector.load %arg2[%c0_1, %c0_2] : memref<32x32xf32, #tpu.memory_space<vmem>>, vector<32x32xf32>
    %cst = arith.constant dense<0.000000e+00> : vector<8x32xf32>
    %2 = tpu.matmul %0, %1, %cst {dimension_numbers = #tpu.dot_dimension_numbers<[1], [0], [0], [1], [0, 0, 1, 1], [], []>} : vector<8x32xf32>, vector<32x32xf32>, vector<8x32xf32> -> vector<8x32xf32>
    %c0_3 = arith.constant 0 : index
    %c0_4 = arith.constant 0 : index
    %3 = vector.load %arg3[%c0_3, %c0_4] : memref<1x32xf32, #tpu.memory_space<vmem>>, vector<1x32xf32>
    %4 = vector.broadcast %3 : vector<1x32xf32> to vector<8x32xf32>
    %5 = arith.addf %2, %4 : vector<8x32xf32>
    %cst_5 = arith.constant 0.000000e+00 : f32
    %6 = vector.broadcast %cst_5 : f32 to vector<8x32xf32>
    %7 = arith.maximumf %5, %6 : vector<8x32xf32>
    %c0_6 = arith.constant 0 : index
    %c0_7 = arith.constant 0 : index
    %8 = vector.load %arg4[%c0_6, %c0_7] : memref<1x32xf32, #tpu.memory_space<vmem>>, vector<1x32xf32>
    %9 = vector.broadcast %8 : vector<1x32xf32> to vector<8x32xf32>
    %10 = arith.mulf %7, %9 : vector<8x32xf32>
    %cst_8 = arith.constant dense<0.000000e+00> : vector<8xf32>
    %11 = vector.multi_reduction <add>, %10, %cst_8 [1] : vector<8x32xf32> to vector<8xf32>
    %c0_9 = arith.constant 0 : index
    %c0_10 = arith.constant 0 : index
    %12 = memref.load %arg5[%c0_9, %c0_10] : memref<1x1xf32, #tpu.memory_space<smem>>
    %13 = vector.broadcast %12 : f32 to vector<8xf32>
    %14 = arith.addf %11, %13 : vector<8xf32>
    %15 = vector.shape_cast %14 : vector<8xf32> to vector<1x8xf32>
    %c0_11 = arith.constant 0 : index
    %c0_12 = arith.constant 0 : index
    %16 = vector.load %arg6[%c0_11, %c0_12] : memref<1x8xf32, #tpu.memory_space<vmem>>, vector<1x8xf32>
    tpu.vector_store %arg6[%c0_11, %c0_12], %15 {strides = array<i32>} : memref<1x8xf32, #tpu.memory_space<vmem>>, vector<1x8xf32>,
    return
  }
  func.func @transform_0(%arg0: i32) -> (i32, i32) {
    %c0_i32 = arith.constant 0 : i32
    %c0_i32_0 = arith.constant 0 : i32
    return %arg0, %c0_i32 : i32, i32
  }
  func.func @transform_1(%arg0: i32) -> (i32, i32) {
    %c0_i32 = arith.constant 0 : i32
    %c0_i32_0 = arith.constant 0 : i32
    %c0_i32_1 = arith.constant 0 : i32
    return %c0_i32, %c0_i32_0 : i32, i32
  }
  func.func @transform_2(%arg0: i32) -> (i32, i32) {
    %c0_i32 = arith.constant 0 : i32
    %c0_i32_0 = arith.constant 0 : i32
    %c0_i32_1 = arith.constant 0 : i32
    return %c0_i32, %c0_i32_0 : i32, i32
  }
  func.func @transform_3(%arg0: i32) -> (i32, i32) {
    %c0_i32 = arith.constant 0 : i32
    %c0_i32_0 = arith.constant 0 : i32
    %c0_i32_1 = arith.constant 0 : i32
    return %c0_i32, %c0_i32_0 : i32, i32
  }
  func.func @transform_4(%arg0: i32) -> (i32, i32) {
    %c0_i32 = arith.constant 0 : i32
    %c0_i32_0 = arith.constant 0 : i32
    %c0_i32_1 = arith.constant 0 : i32
    return %c0_i32, %c0_i32_0 : i32, i32
  }
  func.func @transform_5(%arg0: i32) -> (i32, i32) {
    %c0_i32 = arith.constant 0 : i32
    %c0_i32_0 = arith.constant 0 : i32
    return %c0_i32, %arg0 : i32, i32
  }
}

</mosaic_0001>

<bundles_post_ra>
// kernel: critic_layer_forward.1
= control target key start
LH: loop header
LB: loop body
LE: loop exit
PB: predicated region body
PF: predicated region fallthrough
CT: control target
= control target key end

     0   :  { %11 = vsyncpa [#allocation4], 0  ;;  %s322_s0 = inlined_call_operand.hbm [shape: f32[8,32], index: 0, kind: input, shape index: {}]   ;;  %s323_s1 = inlined_call_operand.hbm [shape: f32[32,32], index: 1, kind: input, shape index: {}]   ;;  %s324_s2 = inlined_call_operand.vmem [shape: f32[1,32], index: 2, kind: input, shape index: {}]   ;;  %s325_s3 = inlined_call_operand.vmem [shape: f32[1,32], index: 3, kind: input, shape index: {}]   ;;  %s326_s4 = inlined_call_operand.<no memory space> [shape: f32[1,1], index: 4, kind: input, shape index: {}]   ;;  %s327_s5 = inlined_call_operand.hbm [shape: f32[1,8], index: 5, kind: output, shape index: {}]  }
   0x1   :  { %12 = vsyncpa [#allocation7], 0 }
   0x2   :  { %13 = vsyncpa [#allocation5], 0  ;;  %s267_s18 = smov [#allocation3]   ;;  %s268_s20 = smov [#allocation6]  }
   0x3   :  { %s20_s19 = sshll.u32 %s267_s18, 4  ;;  %s29_s21 = sshll.u32 %s268_s20, 4  ;;  %s21_s19 = int_to_ptr.vmem [resolvable:$true] %s20_s19  ;;  %s30_s21 = int_to_ptr.vmem [resolvable:$true] %s29_s21 }
   0x4   :  { %s209_s22 = scalar_lea.vmem %s21_s19, 128  ;;  %p214_p1 = scmp.lt.s32.totalorder %s21_s19, %s21_s19 }
   0x5   :  { %p210_p0 = scmp.ne.s32.totalorder %s21_s19, %s209_s22  ;;  %p215_p2 = scmp.lt.s32.totalorder %s209_s22, %s209_s22 }
   0x7   :  { %p216_p3 = por %p215_p2, %p214_p1 }
   0x9   :  { %p217_p4 = pnand %p216_p3, %p210_p0 }
   0xb   :  { %220 = shalt.err (!%p217_p4)
}
   0xc   :  { %23 = dma.hbm_to_vmem [thread:$0]  %s322_s0, 128, %s21_s19, [#allocation4]  }
   0xd   :  { %s229_s25 = scalar_lea.vmem %s30_s21, 512  ;;  %p234_p6 = scmp.lt.s32.totalorder %s30_s21, %s30_s21 }
   0xe   :  { %p230_p5 = scmp.ne.s32.totalorder %s30_s21, %s229_s25  ;;  %p235_p7 = scmp.lt.s32.totalorder %s229_s25, %s229_s25 }
  0x10   :  { %p236_p8 = por %p235_p7, %p234_p6 }
  0x12   :  { %p237_p9 = pnand %p236_p8, %p230_p5 }
  0x14   :  { %240 = shalt.err (!%p237_p9)
}
  0x15   :  { %s269_s26 = smov 128   ;;  %s270_s27 = smov 8  }
  0x16   :  { %35 = dma.hbm_to_vmem [thread:$0]  %s323_s1, 512, %s30_s21, [#allocation7], %s269_s26, %s269_s26, %s270_s27  }
  0x17   :  { %261 = dma.done.wait [#allocation4], 128  }
  0x18   :  { %262 = vsyncadd [#allocation4], 4294967168 }
  0x19   :  { %263 = dma.done.wait [#allocation7], 512  }
  0x1a   :  { %264 = vsyncadd [#allocation7], 4294966784  ;;  %v271_v0 = vmov 0.0   ;;  %vm272_vm0 = vmmov 0   ;;  %v52_v1 = vld [vmem:[#allocation6 + $0x18] sm:$0xff]  ;;  %v51_v2 = vld [vmem:[#allocation6 + $0x10] sm:$0xff]  ;;  %v150_v14 = vlaneseq  ;;  %v147_v17 = vstv %s326_s4 }
  0x1b   :  { %183 = vmatprep.subr.mxu0 %v271_v0  ;;  %191 = vmatprep.mubr.msk.f32.mxu0 %vm272_vm0, %v271_v0  ;;  %v50_v3 = vld [vmem:[#allocation6 + $0x8] sm:$0xff]  ;;  %v49_v4 = vld [vmem:[#allocation6] sm:$0xff]  ;;  %v48_v5 = vld [vmem:[#allocation3] sm:$0xff]  ;;  %vm60_vm1 = vcmask 261120   ;;  %vm157_vm2 = vcmask 57344  }
  0x1c   :  { %184 = vmatpush3.msra.mxu0 %v52_v1  ;;  %v175_v6 = vld [vmem:[%s324_s2] ss:$0 sm:$0xff]  ;;  %v151_v15 = vand.u32 127, %v150_v14  ;;  %v153_v16 = vshrl.u32 %v150_v14, 7  ;;  %s273_s2 = smov [#allocation8]  }
  0x1d   :  { %185 = vmatprep.subr.mxu0 %v271_v0  ;;  %v177_v10 = vld [vmem:[%s325_s3] ss:$0 sm:$0xff]  ;;  %s165_s9 = sshll.u32 %s273_s2, 4  ;;  %s166_s9 = int_to_ptr.vmem [resolvable:$true] %s165_s9 }
  0x1e   :  { %186 = vmatpush3.msra.mxu0 %v51_v2  ;;  %v154_v18 = vsub.s32 %v151_v15, %v153_v16  ;;  %s241_s3 = scalar_lea.vmem %s166_s9, 16  ;;  %s245_s10 = scalar_lea.vmem %s166_s9, 32 }
  0x1f   :  { %187 = vmatprep.subr.mxu0 %v271_v0  ;;  %p242_p10 = scmp.ne.s32.totalorder %s166_s9, %s241_s3  ;;  %p246_p11 = scmp.lt.s32.totalorder %s166_s9, %s166_s9 }
  0x20   :  { %188 = vmatpush3.msra.mxu0 %v50_v3  ;;  %p247_p12 = scmp.lt.s32.totalorder %s245_s10, %s241_s3 }
  0x21   :  { %189 = vmatprep.subr.mxu0 %v271_v0 }
  0x22   :  { %190 = vmatpush3.msra.mxu0 %v49_v4  ;;  %p248_p13 = por %p247_p12, %p246_p11 }
  0x23   :  { %192 = vmatmul.mubr.msk.f32.vlgmr.msra.gmra.mxu0 %vm60_vm1, %v48_v5 }
  0x24   :  { %p249_p0 = pnand %p248_p13, %p242_p10 }
  0xe3   :  { %v130_v7 = vpop.f32.mrf.mxu0 }
  0xe4   :  { %v131_v8 = vadd.f32 %v175_v6, %v130_v7 }
  0xe5   :  { %v193_v9 = vpop.f32.mrf.mxu0 }
  0xe6   :  { %v134_v11 = vmax.f32 %v131_v8, 0.0 }
  0xe8   :  { %v142_v12 = vmul.f32 %v177_v10, %v134_v11 }
  0xea   :  { %v143_v13 = vsel %vm60_vm1, %v142_v12, 0.0 }
  0xeb   :  { %144 = vadd.xlane.f32.xlu0 %v143_v13 }
 0x174   :  { %v145_v19 = vpop.xlane.xlu0 %144 }
 0x175   :  { %v148_v20 = vadd.f32 %v147_v17, %v145_v19 }
 0x177   :  { %v155_v21 = vrot.slane %v148_v20, %v154_v18 }
 0x179   :  { %158 = vst.msk [vmem:[#allocation8] sm:$0x1] %vm157_vm2, %v155_v21 }
 0x17a   :  { %252 = shalt.err (!%p249_p0)
}
 0x17b   :  { %168 = dma.vmem_to_hbm [thread:$0]  %s166_s9, 16, %s327_s5, [#allocation5]  }
 0x17c   :  { %265 = dma.done.wait [#allocation5], 16  }
 0x17d   :  { %266 = vsyncadd [#allocation5], 4294967280 }
 0x17e   :  { %172 = vsyncpa [#allocation4], 1 }
 0x17f   :  { %173 = vsyncpa [#allocation7], 1 }
 0x180   :  { %174 = vsyncpa [#allocation5], 1 }

</bundles_post_ra>
